<compile_context>
chip_gen: v6e
topology: v6e:2x2x1
jax: 0.10.0
libtpu: 0.0.40
codegen_flags: <defaults>
</compile_context>

<pallas_src>
import math

import jax
import jax.numpy as jnp
from jax.experimental import pallas as pl
from jax.experimental.pallas import tpu as pltpu

_LANES = 128                            # full vreg lane width -> unmasked vld/vst
_SMALL_BYTES = 256 * 1024               # single-block (no-grid) fast-path threshold
_TARGET_BLOCK_BYTES = 4 * 1024 * 1024   # per-block budget for the tiled path
_MIN_GRID_STEPS = 8                     # keep the pipeline (and both v7x TCs) busy


def _abs_add_kernel(a_ref, o_ref):
    # Elementwise hot path: abs(a + a). One VPU add + abs per vreg.
    a = a_ref[...]
    o_ref[...] = jnp.abs(a + a)


def _abs_add_2d(x: jax.Array) -> jax.Array:
    """Run the Pallas kernel on a lane-dense (rows, 128) slab."""
    rows, lanes = x.shape
    dtype = x.dtype
    dtype_bytes = jnp.dtype(dtype).itemsize
    total_bytes = rows * lanes * dtype_bytes

    if total_bytes <= _SMALL_BYTES:
        # Tiny path: whole array as a single VMEM block -- no grid machinery.
        # TODO(synk): for truly tiny tensors (like the 8 KiB test shape) a fused
        # XLA elementwise is as fast; Pallas kept here so the op is a kernel.
        return pl.pallas_call(
            _abs_add_kernel,
            out_shape=jax.ShapeDtypeStruct((rows, lanes), dtype),
            in_specs=[pl.BlockSpec(memory_space=pltpu.MemorySpace.VMEM)],
            out_specs=pl.BlockSpec(memory_space=pltpu.MemorySpace.VMEM),
        )(x)

    # Gridded path: multi-MiB blocks to amortize the ~0.35us/step overhead,
    # but at least _MIN_GRID_STEPS steps so input fetch / compute / writeback
    # overlap and a v7x megacore grid has work for both TensorCores.
    sublane = max(8, 32 // dtype_bytes)        # 8 for f32, 16 for bf16, 32 for i8
    row_bytes = lanes * dtype_bytes
    tile_bytes = min(
        _TARGET_BLOCK_BYTES,
        max(total_bytes // _MIN_GRID_STEPS, sublane * row_bytes),
    )
    tile_rows = max(sublane, (tile_bytes // row_bytes) // sublane * sublane)
    tile_rows = min(tile_rows, rows)
    grid = (pl.cdiv(rows, tile_rows),)         # ragged last block masked by Pallas

    return pl.pallas_call(
        _abs_add_kernel,
        out_shape=jax.ShapeDtypeStruct((rows, lanes), dtype),
        grid_spec=pltpu.PrefetchScalarGridSpec(
            num_scalar_prefetch=0,
            grid=grid,
            in_specs=[pl.BlockSpec((tile_rows, lanes), lambda i: (i, 0))],
            out_specs=pl.BlockSpec((tile_rows, lanes), lambda i: (i, 0)),
        ),
        compiler_params=pltpu.CompilerParams(
            # Pure elementwise -> grid axis is independent; lets v7x split the
            # grid across its 2 TensorCores. Harmless on v5e/v6e.
            dimension_semantics=("parallel",),
            # 4 MiB x (in+out) x 2 buffers = 16 MiB; 24 MiB leaves headroom and
            # lifts v5e's 16 MiB scoped-VMEM default.
            vmem_limit_bytes=24 << 20,
        ),
    )(x)


def simple_abs_forward(a: jax.Array) -> jax.Array:
    """Compute abs(a + a) with a Pallas TPU kernel (float dtypes, any shape)."""
    orig_shape = a.shape
    total = math.prod(orig_shape) if orig_shape else 1

    # Empty or smaller than one vreg row: launch overhead dwarfs the work.
    if total < _LANES:
        return jnp.abs(a + a)

    flat = a.reshape(-1)                       # contiguous view, no copy
    main_total = (total // _LANES) * _LANES
    rows = main_total // _LANES

    if main_total == total:
        # Common case (incl. the test shape): pure reshape views, zero copies.
        main_in = flat.reshape(rows, _LANES)
        return _abs_add_2d(main_in).reshape(orig_shape)

    # Ragged total: kernel on the 128-aligned prefix, plain jnp on the <128
    # element (<512 B) remainder -- no full-array pad/slice round-trips.
    main_in = flat[:main_total].reshape(rows, _LANES)
    out_main = _abs_add_2d(main_in).reshape(main_total)
    tail = flat[main_total:]
    out_flat = jnp.concatenate([out_main, jnp.abs(tail + tail)])
    return out_flat.reshape(orig_shape)


if __name__ == "__main__":
    key = jax.random.PRNGKey(0)
    # NCHW, small shape consistent with the torch_glow test input.
    x = jax.random.normal(key, (2, 4, 16, 16), dtype=jnp.float32)

    out = simple_abs_forward(x)
    jax.block_until_ready(out)

    # Reference check against plain JAX.
    ref = jnp.abs(x + x)
    assert out.shape == ref.shape and out.dtype == ref.dtype
    assert jnp.allclose(out, ref), "mismatch vs reference"

    print("KERNEL_OK")
</pallas_src>

<mosaic_0001>
module attributes {stable_mosaic.version = 11 : i64} {
  func.func @_abs_add_kernel(%arg0: memref<16x128xf32, #tpu.memory_space<vmem>>, %arg1: memref<16x128xf32, #tpu.memory_space<vmem>>) attributes {dimension_semantics = [], scalar_prefetch = 0 : i64, scratch_operands = 0 : i64, tpu.core_type = #tpu.core_type<tc>} {
    %c0 = arith.constant 0 : index
    %c0_0 = arith.constant 0 : index
    %0 = vector.load %arg0[%c0, %c0_0] : memref<16x128xf32, #tpu.memory_space<vmem>>, vector<16x128xf32>
    %1 = arith.addf %0, %0 : vector<16x128xf32>
    %2 = math.absf %1 : vector<16x128xf32>
    %c0_1 = arith.constant 0 : index
    %c0_2 = arith.constant 0 : index
    %3 = vector.load %arg1[%c0_1, %c0_2] : memref<16x128xf32, #tpu.memory_space<vmem>>, vector<16x128xf32>
    tpu.vector_store %arg1[%c0_1, %c0_2], %2 {strides = array<i32>} : memref<16x128xf32, #tpu.memory_space<vmem>>, vector<16x128xf32>,
    return
  }
}

</mosaic_0001>

<bundles_post_ra>
// kernel: tpu_custom_call.1
= control target key start
LH: loop header
LB: loop body
LE: loop exit
PB: predicated region body
PF: predicated region fallthrough
CT: control target
= control target key end

     0   :  { %6 = vsyncpa [#allocation3], 0  ;;  %s116_s0 = inlined_call_operand.hbm [shape: f32[16,128], index: 0, kind: input, shape index: {}]   ;;  %s117_s1 = inlined_call_operand.hbm [shape: f32[16,128], index: 1, kind: output, shape index: {}]  }
   0x1   :  { %7 = vsyncpa [#allocation4], 0  ;;  %s96_s6 = smov [#allocation2]  }
   0x2   :  { %s13_s7 = sshll.u32 %s96_s6, 4  ;;  %s14_s7 = int_to_ptr.vmem [resolvable:$true] %s13_s7 }
   0x3   :  { %s60_s8 = scalar_lea.vmem %s14_s7, 256  ;;  %p65_p1 = scmp.lt.s32.totalorder %s14_s7, %s14_s7 }
   0x4   :  { %p61_p0 = scmp.ne.s32.totalorder %s14_s7, %s60_s8  ;;  %p66_p2 = scmp.lt.s32.totalorder %s60_s8, %s60_s8 }
   0x6   :  { %p67_p3 = por %p66_p2, %p65_p1 }
   0x8   :  { %p68_p4 = pnand %p67_p3, %p61_p0 }
   0xa   :  { %71 = shalt.err (!%p68_p4)
}
   0xb   :  { %s97_s9 = smov 128   ;;  %s98_s10 = smov 8  }
   0xc   :  { %19 = dma.hbm_to_vmem [thread:$0]  %s116_s0, 256, %s14_s7, [#allocation3], %s97_s9, %s97_s9, %s98_s10  }
   0xd   :  { %92 = dma.done.wait [#allocation3], 256  }
   0xe   :  { %93 = vsyncadd [#allocation3], 4294967040  ;;  %v23_v0 = vld [vmem:[#allocation2] sm:$0xff]  ;;  %v24_v1 = vld [vmem:[#allocation2 + $0x8] sm:$0xff]  ;;  %s99_s13 = smov [#allocation5]  }
   0xf   :  { %s36_s14 = sshll.u32 %s99_s13, 4  ;;  %v25_v2 = vadd.f32 %v23_v0, %v23_v0  ;;  %v26_v3 = vadd.f32 %v24_v1, %v24_v1  ;;  %s37_s14 = int_to_ptr.vmem [resolvable:$true] %s36_s14 }
  0x10   :  { %s72_s15 = scalar_lea.vmem %s37_s14, 256  ;;  %p77_p6 = scmp.lt.s32.totalorder %s37_s14, %s37_s14 }
  0x11   :  { %v27_v4 = vand.u32 2147483647, %v25_v2  ;;  %v28_v5 = vand.u32 2147483647, %v26_v3  ;;  %p73_p5 = scmp.ne.s32.totalorder %s37_s14, %s72_s15  ;;  %p78_p7 = scmp.lt.s32.totalorder %s72_s15, %s72_s15 }
  0x13   :  { %29 = vst [vmem:[#allocation5] sm:$0xff] %v27_v4  ;;  %30 = vst [vmem:[#allocation5 + $0x8] sm:$0xff] %v28_v5  ;;  %p79_p8 = por %p78_p7, %p77_p6 }
  0x15   :  { %p80_p9 = pnand %p79_p8, %p73_p5 }
  0x17   :  { %83 = shalt.err (!%p80_p9)
}
  0x18   :  { %42 = dma.vmem_to_hbm [thread:$0]  %s37_s14, 256, %s117_s1, [#allocation4], %s97_s9, %s97_s9, %s98_s10  }
  0x19   :  { %94 = dma.done.wait [#allocation4], 256  }
  0x1a   :  { %95 = vsyncadd [#allocation4], 4294967040 }
  0x1b   :  { %46 = vsyncpa [#allocation3], 1 }
  0x1c   :  { %47 = vsyncpa [#allocation4], 1 }

</bundles_post_ra>
